<compile_context>
chip_gen: v5e
topology: v5e:2x2
jax: 0.10.0
libtpu: 0.0.40
codegen_flags: <defaults>
</compile_context>

<pallas_src>
import math

import jax
import jax.numpy as jnp
from jax.experimental import pallas as pl
from jax.experimental.pallas import tpu as pltpu


_LANE = 128
# Tile (double-buffered in+out) VMEM budget. 28 MiB is safe on v7x (64 MiB/TC) and leaves
# plenty of room on v5e/v6e (128 MiB).
_TILE_VMEM_BUDGET = 28 * 1024 * 1024


def _round_up(n, m):
    return ((n + m - 1) // m) * m


def prepare_token_embedding_weight(weight):
    """One-time weight prep (hoisted out of the per-call path).

    weight: (d_model, c_in, 3) -- PyTorch Conv1d layout.
    Returns w_fused of shape (3*c_in, d_model) laid out so that
      y[t] = concat(x[(t-1)%L], x[t], x[(t+1)%L]) @ w_fused
    reproduces Conv1d(kernel_size=3, padding=1, padding_mode='circular', bias=False).
    """
    D, C, K = weight.shape
    assert K == 3
    # row index = k*C + c  <->  im2col column order [x[t-1], x[t], x[t+1]] per channel
    return jnp.transpose(weight, (2, 1, 0)).reshape(K * C, D)


def _pick_seq_tile(B, L, C, D, in_itemsize, out_itemsize, budget_bytes):
    """VMEM-budget-driven sequence tile (multiple of 8), with a >=2-block guarantee."""
    in_row = _round_up(3 * C, _LANE) * in_itemsize      # lane-padded input row
    out_row = _round_up(D, _LANE) * out_itemsize        # lane-padded output row
    per_row = 2 * (in_row + out_row)                    # double-buffered in + out
    tl = max(8, (budget_bytes // per_row) // 8 * 8)
    tl = min(tl, _round_up(L, 8))
    # v7x: make sure both TensorCores get at least one block when possible.
    if B * pl.cdiv(L, tl) < 2 and L > 8:
        tl = max(8, _round_up(pl.cdiv(L, 2), 8))
    return tl


def _token_embedding_kernel(x_ref, w_ref, o_ref):
    # x_ref: (TL, 3C)   w_ref: (3C, D) resident   o_ref: (TL, D)
    # TODO(synk): epilogue hook — fuse any downstream elementwise (positional add, scale)
    # here before the store; VPU slots are idle in this mem-bound kernel.
    o_ref[...] = jnp.dot(
        x_ref[...], w_ref[...], preferred_element_type=jnp.float32
    ).astype(o_ref.dtype)


def token_embedding(x, w_fused, *, out_dtype=None, compute_dtype=jnp.bfloat16,
                    tile_vmem_budget=_TILE_VMEM_BUDGET):
    """x: (B, L, c_in); w_fused from prepare_token_embedding_weight.
    Returns (B, L, d_model) in `out_dtype` (default: x.dtype)."""
    B, L, C = x.shape
    K3C, D = w_fused.shape
    assert K3C == 3 * C
    out_dtype = x.dtype if out_dtype is None else out_dtype

    # Circular im2col along the sequence axis -> a single fused K=3C matmul.
    x_unf = jnp.concatenate(
        [jnp.roll(x, 1, axis=1), x, jnp.roll(x, -1, axis=1)], axis=-1
    )  # (B, L, 3C)

    # bf16 operands for the MXU (halves the secondary input stream; f32 accumulation).
    if compute_dtype is not None:
        x_unf = x_unf.astype(compute_dtype)
        w_fused = w_fused.astype(compute_dtype)
    # TODO(synk): if the lane-padded (TL, 3C->128) input DMA shows up in profiles, switch
    # to a (B, 3C, L) layout with the contraction dim on sublanes.

    in_itemsize = x_unf.dtype.itemsize
    out_itemsize = jnp.dtype(out_dtype).itemsize
    TL = _pick_seq_tile(B, L, C, D, in_itemsize, out_itemsize, tile_vmem_budget)
    grid = (B, pl.cdiv(L, TL))   # cdiv grid: ragged L handled by masked boundary blocks

    # Size the VMEM request from actual need + headroom (v7x has only 64 MiB/TC).
    in_tile = TL * _round_up(3 * C, _LANE) * in_itemsize
    out_tile = TL * _round_up(D, _LANE) * out_itemsize
    w_bytes = _round_up(3 * C, 8) * _round_up(D, _LANE) * w_fused.dtype.itemsize
    vmem_need = 2 * (in_tile + out_tile) + 2 * w_bytes + (2 << 20)
    vmem_limit = int(min(max(vmem_need, 16 << 20), 48 << 20))

    y = pl.pallas_call(
        _token_embedding_kernel,
        out_shape=jax.ShapeDtypeStruct((B, L, D), out_dtype),
        grid=grid,
        in_specs=[
            pl.BlockSpec((pl.Squeezed(), TL, 3 * C), lambda b, l: (b, l, 0)),
            # constant index_map -> weights fetched once, stay resident in VMEM
            pl.BlockSpec((3 * C, D), lambda b, l: (0, 0)),
        ],
        out_specs=pl.BlockSpec((pl.Squeezed(), TL, D), lambda b, l: (b, l, 0)),
        compiler_params=pltpu.CompilerParams(
            dimension_semantics=("parallel", "parallel"),
            vmem_limit_bytes=vmem_limit,
        ),
    )(x_unf, w_fused)

    return y


def init_conv1d_weight(key, c_in, d_model, kernel_size=3):
    """kaiming_normal_(mode='fan_in', nonlinearity='leaky_relu') for Conv1d weight
    of shape (d_model, c_in, kernel_size)."""
    fan_in = c_in * kernel_size
    negative_slope = 0.01  # PyTorch default `a` for leaky_relu
    gain = math.sqrt(2.0 / (1.0 + negative_slope ** 2))
    std = gain / math.sqrt(fan_in)
    return std * jax.random.normal(key, (d_model, c_in, kernel_size), jnp.float32)


if __name__ == "__main__":
    key = jax.random.PRNGKey(0)
    k_x, k_w = jax.random.split(key)

    B, L, c_in, d_model = 2, 8, 4, 32
    x = jax.random.normal(k_x, (B, L, c_in), jnp.float32)
    weight = init_conv1d_weight(k_w, c_in, d_model, kernel_size=3)

    w_fused = prepare_token_embedding_weight(weight)   # one-time prep
    y = token_embedding(x, w_fused)                    # bf16 operands, f32 out
    y = jax.block_until_ready(y)

    # reference: circular conv1d via shifted matmuls in plain JAX (full f32)
    w_taps = jnp.transpose(weight, (2, 1, 0))  # (3, c_in, d_model)
    x_prev = jnp.roll(x, 1, axis=1)
    x_next = jnp.roll(x, -1, axis=1)
    y_ref = (jnp.einsum("blc,cd->bld", x_prev, w_taps[0])
             + jnp.einsum("blc,cd->bld", x, w_taps[1])
             + jnp.einsum("blc,cd->bld", x_next, w_taps[2]))

    assert y.shape == (B, L, d_model)
    # bf16 operands -> loosened tolerance vs. the f32 reference
    assert jnp.allclose(y, y_ref, atol=5e-2, rtol=5e-2)
    print("KERNEL_OK")
</pallas_src>

<mosaic_0001>
module attributes {stable_mosaic.version = 11 : i64} {
  func.func @_token_embedding_kernel(%arg0: i32, %arg1: i32, %arg2: memref<1x8x12xbf16, #tpu.memory_space<vmem>>, %arg3: memref<12x32xbf16, #tpu.memory_space<vmem>>, %arg4: memref<1x8x32xf32, #tpu.memory_space<vmem>>) attributes {dimension_semantics = [#tpu.dimension_semantics<parallel>, #tpu.dimension_semantics<parallel>], iteration_bounds = array<i64: 2, 1>, scalar_prefetch = 0 : i64, scratch_operands = 0 : i64, tpu.core_type = #tpu.core_type<tc>, window_params = [{transform_indices = @transform_0, window_bounds = array<i64: 1, 8, 12>}, {pipeline_mode = #tpu.pipeline_mode<synchronous>, transform_indices = @transform_1, window_bounds = array<i64: 12, 32>}, {transform_indices = @transform_2, window_bounds = array<i64: 1, 8, 32>}]} {
    %c0 = arith.constant 0 : index
    %c0_0 = arith.constant 0 : index
    %c0_1 = arith.constant 0 : index
    %0 = vector.load %arg2[%c0, %c0_0, %c0_1] : memref<1x8x12xbf16, #tpu.memory_space<vmem>>, vector<1x8x12xbf16>
    %1 = vector.shape_cast %0 : vector<1x8x12xbf16> to vector<8x12xbf16>
    %c0_2 = arith.constant 0 : index
    %c0_3 = arith.constant 0 : index
    %2 = vector.load %arg3[%c0_2, %c0_3] : memref<12x32xbf16, #tpu.memory_space<vmem>>, vector<12x32xbf16>
    %cst = arith.constant dense<0.000000e+00> : vector<8x32xf32>
    %3 = tpu.matmul %1, %2, %cst {dimension_numbers = #tpu.dot_dimension_numbers<[1], [0], [0], [1], [0, 0, 1, 1], [], []>} : vector<8x12xbf16>, vector<12x32xbf16>, vector<8x32xf32> -> vector<8x32xf32>
    %c0_4 = arith.constant 0 : index
    %c0_5 = arith.constant 0 : index
    %c0_6 = arith.constant 0 : index
    %4 = vector.load %arg4[%c0_4, %c0_5, %c0_6] : memref<1x8x32xf32, #tpu.memory_space<vmem>>, vector<1x8x32xf32>
    %5 = vector.shape_cast %4 : vector<1x8x32xf32> to vector<8x32xf32>
    %6 = vector.shape_cast %3 : vector<8x32xf32> to vector<1x8x32xf32>
    tpu.vector_store %arg4[%c0_4, %c0_5, %c0_6], %6 {strides = array<i32>} : memref<1x8x32xf32, #tpu.memory_space<vmem>>, vector<1x8x32xf32>,
    return
  }
  func.func @transform_0(%arg0: i32, %arg1: i32) -> (i32, i32, i32) {
    %c0_i32 = arith.constant 0 : i32
    %c0_i32_0 = arith.constant 0 : i32
    return %arg0, %arg1, %c0_i32 : i32, i32, i32
  }
  func.func @transform_1(%arg0: i32, %arg1: i32) -> (i32, i32) {
    %c0_i32 = arith.constant 0 : i32
    %c0_i32_0 = arith.constant 0 : i32
    %c0_i32_1 = arith.constant 0 : i32
    return %c0_i32, %c0_i32_0 : i32, i32
  }
  func.func @transform_2(%arg0: i32, %arg1: i32) -> (i32, i32, i32) {
    %c0_i32 = arith.constant 0 : i32
    %c0_i32_0 = arith.constant 0 : i32
    return %arg0, %arg1, %c0_i32 : i32, i32, i32
  }
}

</mosaic_0001>

<bundles_post_ra>
// kernel: tpu_custom_call.1
= control target key start
LH: loop header
LB: loop body
LE: loop exit
PB: predicated region body
PF: predicated region fallthrough
CT: control target
= control target key end

     0   :  { %7 = vsyncpa [#allocation3], 0  ;;  %s740_s0 = inlined_call_operand.hbm [shape: bf16[2,8,12], index: 0, kind: input, shape index: {}]   ;;  %s741_s1 = inlined_call_operand.hbm [shape: bf16[12,32], index: 1, kind: input, shape index: {}]   ;;  %s742_s2 = inlined_call_operand.hbm [shape: f32[2,8,32], index: 2, kind: output, shape index: {}]  }
   0x1   :  { %9 = vsyncpa [#allocation3 + $0x1], 0 }
   0x2   :  { %10 = vsyncpa [#allocation6], 0 }
   0x3   :  { %11 = vsyncpa [#allocation4], 0 }
   0x4   :  { %13 = vsyncpa [#allocation4 + $0x1], 0  ;;  %s596_s9 = smov 0   ;;  %s598_s10 = smov 0  }
   0x5   :  { %s600_s11 = smov 0   ;;  %s602_s12 = smov 0  }
   0x6   :  { %s604_s13 = smov 0   ;;  %s606_s14 = smov 0  }
   0x7 LB: > { %s334_s15 = sadd.s32 4294967295, %s576_s14   ;;  %p336_p0 = scmp.ge.s32.totalorder %s576_s14, 1  ;;  %s576_s14 = sphi %s606_s14, %s19_s14   ;;  %s572_s13 = sphi %s604_s13, %s753_s13   ;;  %s568_s12 = sphi %s602_s12, %s752_s12   ;;  %s564_s11 = sphi %s600_s11, %s751_s11   ;;  %s560_s10 = sphi %s598_s10, %s750_s10   ;;  %s556_s9 = sphi %s596_s9, %s749_s9  }
   0x8   : > { %p628_p1 = scmp.eq.s32.totalorder %s334_s15, 0  ;;  %p113_p2 = scmp.lt.s32.totalorder %s576_s14, 3 }
   0x9   : > { %s124_s19 = sshll.u32 %s741_s1, 4  ;;  %s578_s21 = smov [#allocation5]   ;;  %s125_s19 = int_to_ptr.hbm [resolvable:$true] %s124_s19 }
   0xa   : > { %p636_p3 = pnand %p336_p0, %p113_p2  ;;  %s126_s22 = sshll.u32 %s578_s21, 4  ;;  %s127_s22 = int_to_ptr.vmem [resolvable:$true] %s126_s22 }
   0xb   : > { %p338_p6 = scmp.ge.s32.totalorder %s576_s14, 2  ;;  %s579_s23 = smov 64  }
   0xc   : > { %p363_p4 = pneg %p636_p3  ;;  %s580_s24 = smov 4  }
   0xd   : > { %s335_s25 = sadd.s32 4294967294, %s576_s14   ;;  %s31_s26 = sadd.s32 1, %s572_s13 }
   0xe   : > { %p364_p5 = pnand %p363_p4, %p628_p1  ;;  %s40_s27 = sadd.s32 1, %s564_s11 }
   0xf   : > { %p33_p7 = scmp.ge.s32.totalorder %s31_s26, 2  ;;  %p47_p8 = scmp.ne.s32.totalorder %s564_s11, %s560_s10 }
  0x10   : > { %366 = dma.hbm_to_vmem [thread:$0]  (!%p364_p5), %s125_s19, 128, %s127_s22, [#allocation6], %s579_s23, %s579_s23, %s580_s24  }
  0x11   : > { %p48_p9 = scmp.eq.s32.totalorder %s576_s14, 0  ;;  %p53_p10 = scmp.ne.s32.totalorder %s560_s10, %s556_s9 }
  0x12   : > { %s755_s26 = smov (%p33_p7, %s31_s26), 0  ;;  %p100_p13 = scmp.eq.s32.totalorder %s334_s15, 1 }
  0x13   : > { %p655_p11 = por %p48_p9, %p47_p8  ;;  %p661_p12 = por %p628_p1, %p53_p10 }
  0x14   : > { %s35_s30 = ssub.s32 %s572_s13, %s755_s26  ;;  %p106_p2 = scmp.eq.s32.totalorder %s335_s25, 1 }
  0x15   : > { %p38_p0 = scmp.eq.s32.totalorder %s35_s30, 0  ;;  %p667_p4 = por %p100_p13, %p47_p8 }
  0x16   : > { %p376_p5 = scmp.lt.s32.totalorder %s576_s14, 2  ;;  %p675_p7 = por %p106_p2, %p53_p10 }
  0x17   : > { %s673_s4 = scalar_select %p38_p0, %s564_s11, %s40_s27  }
  0x18   : > { %s140_s6 = sand.u32 1, %s564_s11   ;;  %s340_s8 = sshll.u32 %s572_s13, 2 }
  0x19   : > { %s339_s7 = sshll.u32 %s140_s6, 2  ;;  %s149_s15 = scalar_lea.hbm %s740_s0, %s340_s8 }
  0x1a   : > { %s144_s19 = scalar_lea.vmem [#allocation2], %s339_s7  ;;  %s151_s22 = sshll.u32 %s149_s15, 4  ;;  %s152_s22 = int_to_ptr.hbm [resolvable:$true] %s151_s22 }
  0x1b   : > { %s153_s21 = sshll.u32 %s144_s19, 4  ;;  %p368_p8 = pnand %p376_p5, %p655_p11  ;;  %s154_s21 = int_to_ptr.vmem [resolvable:$true] %s153_s21 }
  0x1c   : > { %s141_s23 = scalar_lea.sflag [#allocation3], %s140_s6  ;;  %162 = sbr.rel (%p636_p3) target bundleno = 177 (0xb1), region = 28 }
  0x1d   : > { %370 = dma.hbm_to_vmem [thread:$0]  (!%p368_p8), %s152_s22, 64, %s154_s21, %s141_s23  }
  0x1e   : > { %s689_s24 = sand.u32 (!%p636_p3), 1, %s560_s10  }
  0x1f   : > { %s342_s25 = sshll.u32 (!%p636_p3), %s689_s24, 2  ;;  %s165_s27 = scalar_lea.sflag (!%p636_p3), [#allocation3], %s689_s24 }
  0x20   : > { %s168_s30 = scalar_lea.vmem (!%p636_p3), [#allocation2], %s342_s25 }
  0x21   : > { %543 = dma.done.wait (%p661_p12), %s165_s27, 64  }
  0x22   : > { %545 = vsyncadd (%p661_p12), %s165_s27, 4294967232 }
  0x23   : > { %547 = dma.done.wait (%p628_p1), [#allocation6], 128  }
  0x24   : > { %549 = vsyncadd (%p628_p1), [#allocation6], 4294967168  ;;  %v347_v0 = vld [vmem:[#allocation5] sm:$0xf]  ;;  %v354_v1 = vld [vmem:[#allocation5] sm:$0x30] }
  0x25   : > { %vm208_vm0 = vcmask 1045504   ;;  %v348_v2 = vor.u32 %v354_v1, %v347_v0  ;;  %v196_v4 = vld [vmem:[%s168_s30] sm:$0xf]  ;;  %vm204_vm1 = vcmask 97280   ;;  %s351_s20 = sshll.u32 %s568_s12, 3  ;;  %s344_s28 = sshll.u32 %s689_s24, 3 }
  0x26   : > { %s239_s16 = scalar_lea.hbm %s742_s2, %s351_s20  ;;  %s194_s7 = scalar_lea.vmem [#allocation7], %s344_s28  ;;  %vm225_vm2 = vcmask 261120  }
  0x27   : > { %v210_v3 = vsel %vm208_vm0, %v348_v2, 0  ;;  %s241_s8 = sshll.u32 %s194_s7, 4  ;;  %s243_s17 = sshll.u32 %s239_s16, 4  ;;  %s242_s8 = int_to_ptr.vmem [resolvable:$true] %s241_s8  ;;  %s244_s17 = int_to_ptr.hbm [resolvable:$true] %s243_s17 }
  0x28   : > { %219 = vmatpush.bf16.msra.mxu0 %v210_v3  ;;  %s228_s18 = scalar_lea.sflag [#allocation4], %s689_s24  ;;  %s504_s15 = sshra.s32 %s244_s17, 4  ;;  %s505_s15 = int_to_ptr.hbm [resolvable:$true] %s504_s15 }
  0x29   : > { %s506_s19 = scalar_lea.hbm %s505_s15, 8  ;;  %s510_s22 = scalar_lea.hbm %s742_s2, 16 }
  0x2a   : > { %p507_p1 = scmp.ne.s32.totalorder %s505_s15, %s506_s19  ;;  %p511_p10 = scmp.lt.s32.totalorder %s505_s15, %s742_s2 }
  0x2b   : > { %349 = vmatmul.msk.bf16.vlgmr.msra.gmra.mxu0 %vm204_vm1, %v196_v4  ;;  %p512_p11 = scmp.lt.s32.totalorder %s510_s22, %s506_s19 }
  0x2c   : > { %p508_p3 = pnand %p507_p1, %p667_p4 }
  0x2d   : > { %p513_p12 = por %p512_p11, %p511_p10 }
  0x2e   : > { %p509_p9 = pneg %p508_p3 }
  0x30   : > { %p514_p13 = pnand %p513_p12, %p509_p9 }
  0xa8   : > { %v221_v5 = vpop.f32.mrf.mxu0 }
  0xa9   : > { %226 = vst.msk [vmem:[%s194_s7] sm:$0xff] %vm225_vm2, %v221_v5 }
  0xaa   : > { %517 = shalt.err (!%p514_p13)
}
  0xab   : > { %361 = dma.vmem_to_hbm [thread:$0]  (%p667_p4), %s242_s8, 128, %s244_s17, %s228_s18  }
  0xb0   : > { %v223_v6 = vpop.f32.mrf.mxu0 }
  0xb1 PF: > { %s255_s24 = sand.u32 1, %s556_s9   ;;  %p372_p0 = pnand %p338_p6, %p675_p7 }
  0xb2   : > { %s256_s27 = scalar_lea.sflag [#allocation4], %s255_s24 }
  0xb3   : > { %p373_p2 = pneg %p372_p0 }
  0xb5   : > { %551 = dma.done.wait (%p373_p2), %s256_s27, 128  }
  0xb6   : > { %553 = vsyncadd (%p373_p2), %s256_s27, 4294967168  ;;  %s19_s14 = sadd.s32 1, %s576_s14   ;;  %s749_s9 = smov %s560_s10 }
  0xb7   : > { %p16_p5 = scmp.ge.s32.totalorder %s19_s14, 4   ;;  %s750_s10 = smov %s564_s11 }
  0xb8   : > { %s751_s11 = smov %s673_s4  ;;  %s752_s12 = smov %s572_s13 }
  0xb9   : > { %s753_s13 = smov %s755_s26  ;;  %18 = sbr.rel (!%p16_p5) target bundleno = 7 (0x7), region = 77 }
  0xbe   :  { %262 = vsyncpa [#allocation3], 1 }
  0xbf   :  { %264 = vsyncpa [#allocation3 + $0x1], 1 }
  0xc0   :  { %265 = vsyncpa [#allocation6], 1 }
  0xc1   :  { %266 = vsyncpa [#allocation4], 1 }
  0xc2   :  { %268 = vsyncpa [#allocation4 + $0x1], 1 }

</bundles_post_ra>
